<compile_context>
chip_gen: v7x
topology: tpu7x:2x2x1
jax: 0.10.0
libtpu: 0.0.40
codegen_flags: <defaults>
</compile_context>

<pallas_src>
import functools
import math

import numpy as np
import jax
import jax.numpy as jnp
from jax import lax
from jax.experimental import pallas as pl
from jax.experimental.pallas import tpu as pltpu


def _round_up(x, m):
    return ((x + m - 1) // m) * m


def _mha_fused_kernel(q_ref, k_ref, v_ref, wt_ref, b_ref, o_ref, *,
                      heads, scale, matmul_dtype):
    # Block shapes: q/k/v (NB, L, E); wt (E, E_pad) pre-transposed+padded (bf16);
    # b (1, E_pad) f32; o (NB*Lq, E_pad).
    nb, qlen, embed = q_ref.shape
    head_dim = embed // heads

    def to_t_form(x):
        # (NB, L, E) -> (NB*H, D, L): ONE batched minor-2 transpose plus two
        # layout-preserving reshapes (sublane split of E at the 8-aligned head_dim
        # boundary, leading-dim merge).  No per-head masked lane slices.
        llen = x.shape[1]
        xt = jnp.swapaxes(x, -1, -2)                    # (NB, E, L)
        xt = xt.reshape(nb, heads, head_dim, llen)      # (NB, H, D, L)  (tile-aligned)
        return xt.reshape(nb * heads, head_dim, llen)   # (NB*H, D, L)

    def to_n_form(x):
        return jnp.swapaxes(to_t_form(x), -1, -2)       # (NB*H, L, D)

    # 1/sqrt(embed_size) folded into q: touches (NB, L, E) instead of (NB*H, Lq, Lk).
    # NOTE: the PyTorch module scales by sqrt(embed_size), NOT sqrt(head_dim).
    qh = to_n_form(q_ref[...] * scale).astype(matmul_dtype)   # (NB*H, Lq, D)
    kt = to_t_form(k_ref[...]).astype(matmul_dtype)           # (NB*H, D, Lk)
    vh = to_n_form(v_ref[...]).astype(matmul_dtype)           # (NB*H, Lk, D)

    # energy: one (batch x head)-batched matmul, bf16 operands, f32 accumulation.
    s = lax.dot_general(qh, kt, (((2,), (1,)), ((0,), (0,))),
                        preferred_element_type=jnp.float32)   # (NB*H, Lq, Lk) f32

    # Numerically-stable softmax over keys, kept in f32 (v5e-safe); the divide goes
    # to the EUP via approximate reciprocal (~free slot).
    m = jnp.max(s, axis=-1, keepdims=True)
    p = jnp.exp(s - m)
    p = p * pl.reciprocal(jnp.sum(p, axis=-1, keepdims=True), approx=True)
    # TODO(synk): nn.Dropout(0.2) on attention weights omitted (eval-mode identity).

    oh = lax.dot_general(p.astype(matmul_dtype), vh, (((2,), (1,)), ((0,), (0,))),
                         preferred_element_type=jnp.float32)  # (NB*H, Lq, D) f32

    # Merge heads back with the inverse single relayout (no concatenate).
    ot = jnp.swapaxes(oh, -1, -2)                      # (NB*H, D, Lq)
    ot = ot.reshape(nb, heads, head_dim, qlen)         # (NB, H, D, Lq)
    ot = ot.reshape(nb, embed, qlen)                   # (NB, E, Lq)   (tile-aligned)
    merged = jnp.swapaxes(ot, -1, -2).reshape(nb * qlen, embed)  # (NB*Lq, E)

    # Fused output projection; result last dim E_pad is a multiple of 128 ->
    # unmasked, lane-dense stores.
    y = jnp.dot(merged.astype(matmul_dtype), wt_ref[...],
                preferred_element_type=jnp.float32) + b_ref[...]
    o_ref[...] = y.astype(o_ref.dtype)


def multi_head_attention(values, keys, query, fc_w, fc_b, *, heads,
                         matmul_dtype=jnp.bfloat16, target_rows=256):
    N, qlen, embed = query.shape
    klen = keys.shape[1]
    vlen = values.shape[1]
    assert klen == vlen, "key/value sequence lengths must match (PV contraction)"
    head_dim = embed // heads
    assert head_dim * heads == embed, "embed_size must be divisible by heads"
    assert head_dim % 8 == 0, "head_dim must be a multiple of the 8-sublane tile"

    # Intentionally 1/sqrt(embed_size) (matches the PyTorch module), not 1/sqrt(head_dim).
    scale = 1.0 / math.sqrt(embed)

    # ---- batch blocking: amortize per-step overhead, fill the fc_out matmul ----
    nb = max(1, min(N, max(1, target_rows // max(qlen, 1))))

    e_pad = _round_up(embed, 128)

    def _block_vmem_bytes(b):
        hb = b * heads
        qkv_in = 2 * 3 * b * max(qlen, klen) * embed * 4        # double-buffered inputs
        split = 3 * hb * max(qlen, klen) * max(head_dim, 128) * 4
        scores = 2 * hb * qlen * klen * 4
        outb = 2 * b * qlen * e_pad * 4
        weights = 2 * (embed * e_pad + e_pad) * 4
        return qkv_in + split + scores + outb + weights

    while nb > 1 and _block_vmem_bytes(nb) > 24 * 1024 * 1024:
        nb = pl.cdiv(nb, 2)

    n_pad = pl.cdiv(N, nb) * nb
    if n_pad != N:
        pad = ((0, n_pad - N), (0, 0), (0, 0))
        query = jnp.pad(query, pad)
        keys = jnp.pad(keys, pad)
        values = jnp.pad(values, pad)

    # One-time host-side prep: nn.Linear weight (out, in) -> (in, out); pad output
    # features (and bias) up to a 128-lane multiple; cast the weight to bf16.
    wt = fc_w.T
    bias = fc_b
    if e_pad != embed:
        wt = jnp.pad(wt, ((0, 0), (0, e_pad - embed)))
        bias = jnp.pad(bias, (0, e_pad - embed))
    wt = wt.astype(matmul_dtype)
    bias = bias.reshape(1, e_pad).astype(jnp.float32)

    grid = (n_pad // nb,)
    kernel = functools.partial(_mha_fused_kernel, heads=heads, scale=scale,
                               matmul_dtype=matmul_dtype)

    out2d = pl.pallas_call(
        kernel,
        out_shape=jax.ShapeDtypeStruct((n_pad * qlen, e_pad), query.dtype),
        grid=grid,
        in_specs=[
            pl.BlockSpec((nb, qlen, embed), lambda i: (i, 0, 0)),   # q
            pl.BlockSpec((nb, klen, embed), lambda i: (i, 0, 0)),   # k
            pl.BlockSpec((nb, vlen, embed), lambda i: (i, 0, 0)),   # v
            # Resident projection weight/bias.
            # TODO(synk): single-buffer these (pl.Buffered(1)) and K-tile the weight
            # once embed_size is large enough for the double buffer to matter.
            pl.BlockSpec((embed, e_pad), lambda i: (0, 0)),         # fc_w^T (padded)
            pl.BlockSpec((1, e_pad), lambda i: (0, 0)),             # fc_b (padded)
        ],
        out_specs=pl.BlockSpec((nb * qlen, e_pad), lambda i: (i, 0)),
        compiler_params=pltpu.CompilerParams(
            dimension_semantics=("parallel",),
            vmem_limit_bytes=48 * 1024 * 1024,
        ),
    )(query, keys, values, wt, bias)

    # Strip the lane padding / batch padding in the wrapper (cheap XLA slice+reshape).
    out = out2d.reshape(n_pad, qlen, e_pad)[:N, :, :embed]
    return out


def _reference_forward(values, keys, query, fc_w, fc_b, heads):
    # Pure-JAX f32 mirror of the PyTorch forward (eval mode).
    N, L, E = query.shape
    D = E // heads
    v = values.reshape(N, values.shape[1], heads, D)
    k = keys.reshape(N, keys.shape[1], heads, D)
    q = query.reshape(N, L, heads, D)
    energy = jnp.einsum('nqhd,nkhd->nhqk', q, k)
    attn = jax.nn.softmax(energy / jnp.sqrt(jnp.float32(E)), axis=3)
    out = jnp.einsum('nhql,nlhd->nqhd', attn, v).reshape(N, L, E)
    return out @ fc_w.T + fc_b


if __name__ == "__main__":
    N, seq, heads, embed = 2, 8, 4, 32  # head_dim = 8

    key = jax.random.PRNGKey(0)
    k1, k2, k3, k4, k5 = jax.random.split(key, 5)
    values_in = jax.random.normal(k1, (N, seq, embed), jnp.float32)
    keys_in = jax.random.normal(k2, (N, seq, embed), jnp.float32)
    query_in = jax.random.normal(k3, (N, seq, embed), jnp.float32)
    # fc_out parameters; the unused values/keys/queries Linear layers from __init__
    # are intentionally not materialized (forward never applies them).
    fc_w = jax.random.normal(k4, (embed, embed), jnp.float32) * 0.1
    fc_b = jax.random.normal(k5, (embed,), jnp.float32) * 0.1

    out = multi_head_attention(values_in, keys_in, query_in, fc_w, fc_b, heads=heads)
    out = jax.block_until_ready(out)

    ref = _reference_forward(values_in, keys_in, query_in, fc_w, fc_b, heads)
    # Tolerance covers bf16 MXU operands (f32 accumulation) + EUP approx reciprocal.
    np.testing.assert_allclose(np.asarray(out), np.asarray(ref), rtol=4e-2, atol=4e-2)

    print("KERNEL_OK")
</pallas_src>

<mosaic_0001>
module attributes {stable_mosaic.version = 11 : i64} {
  func.func @_mha_fused_kernel(%arg0: i32, %arg1: memref<2x8x32xf32, #tpu.memory_space<vmem>>, %arg2: memref<2x8x32xf32, #tpu.memory_space<vmem>>, %arg3: memref<2x8x32xf32, #tpu.memory_space<vmem>>, %arg4: memref<32x128xbf16, #tpu.memory_space<vmem>>, %arg5: memref<1x128xf32, #tpu.memory_space<vmem>>, %arg6: memref<16x128xf32, #tpu.memory_space<vmem>>) attributes {dimension_semantics = [#tpu.dimension_semantics<parallel>], iteration_bounds = array<i64: 1>, scalar_prefetch = 0 : i64, scratch_operands = 0 : i64, tpu.core_type = #tpu.core_type<tc>, window_params = [{transform_indices = @transform_0, window_bounds = array<i64: 2, 8, 32>}, {transform_indices = @transform_1, window_bounds = array<i64: 2, 8, 32>}, {transform_indices = @transform_2, window_bounds = array<i64: 2, 8, 32>}, {pipeline_mode = #tpu.pipeline_mode<synchronous>, transform_indices = @transform_3, window_bounds = array<i64: 32, 128>}, {pipeline_mode = #tpu.pipeline_mode<synchronous>, transform_indices = @transform_4, window_bounds = array<i64: 1, 128>}, {transform_indices = @transform_5, window_bounds = array<i64: 16, 128>}]} {
    %c0 = arith.constant 0 : index
    %c0_0 = arith.constant 0 : index
    %c0_1 = arith.constant 0 : index
    %0 = vector.load %arg1[%c0, %c0_0, %c0_1] : memref<2x8x32xf32, #tpu.memory_space<vmem>>, vector<2x8x32xf32>
    %cst = arith.constant 0.176776692 : f32
    %1 = vector.broadcast %cst : f32 to vector<2x8x32xf32>
    %2 = arith.mulf %0, %1 : vector<2x8x32xf32>
    %3 = tpu.transpose %2, [0, 2, 1] : vector<2x8x32xf32> -> vector<2x32x8xf32>
    %4 = vector.shape_cast %3 : vector<2x32x8xf32> to vector<2x4x8x8xf32>
    %5 = vector.shape_cast %4 : vector<2x4x8x8xf32> to vector<8x8x8xf32>
    %6 = tpu.transpose %5, [0, 2, 1] : vector<8x8x8xf32> -> vector<8x8x8xf32>
    %7 = arith.truncf %6 : vector<8x8x8xf32> to vector<8x8x8xbf16>
    %c0_2 = arith.constant 0 : index
    %c0_3 = arith.constant 0 : index
    %c0_4 = arith.constant 0 : index
    %8 = vector.load %arg2[%c0_2, %c0_3, %c0_4] : memref<2x8x32xf32, #tpu.memory_space<vmem>>, vector<2x8x32xf32>
    %9 = tpu.transpose %8, [0, 2, 1] : vector<2x8x32xf32> -> vector<2x32x8xf32>
    %10 = vector.shape_cast %9 : vector<2x32x8xf32> to vector<2x4x8x8xf32>
    %11 = vector.shape_cast %10 : vector<2x4x8x8xf32> to vector<8x8x8xf32>
    %12 = arith.truncf %11 : vector<8x8x8xf32> to vector<8x8x8xbf16>
    %c0_5 = arith.constant 0 : index
    %c0_6 = arith.constant 0 : index
    %c0_7 = arith.constant 0 : index
    %13 = vector.load %arg3[%c0_5, %c0_6, %c0_7] : memref<2x8x32xf32, #tpu.memory_space<vmem>>, vector<2x8x32xf32>
    %14 = tpu.transpose %13, [0, 2, 1] : vector<2x8x32xf32> -> vector<2x32x8xf32>
    %15 = vector.shape_cast %14 : vector<2x32x8xf32> to vector<2x4x8x8xf32>
    %16 = vector.shape_cast %15 : vector<2x4x8x8xf32> to vector<8x8x8xf32>
    %17 = tpu.transpose %16, [0, 2, 1] : vector<8x8x8xf32> -> vector<8x8x8xf32>
    %18 = arith.truncf %17 : vector<8x8x8xf32> to vector<8x8x8xbf16>
    %cst_8 = arith.constant dense<0.000000e+00> : vector<8x8x8xf32>
    %19 = tpu.matmul %7, %12, %cst_8 {dimension_numbers = #tpu.dot_dimension_numbers<[2], [1], [1], [2], [0, 0, 0, 1, 1, 2], [0], [0]>} : vector<8x8x8xbf16>, vector<8x8x8xbf16>, vector<8x8x8xf32> -> vector<8x8x8xf32>
    %cst_9 = arith.constant dense<0xFF800000> : vector<8x8xf32>
    %20 = vector.multi_reduction <maximumf>, %19, %cst_9 [2] : vector<8x8x8xf32> to vector<8x8xf32>
    %21 = vector.shape_cast %20 : vector<8x8xf32> to vector<8x8x1xf32>
    %22 = vector.broadcast %21 : vector<8x8x1xf32> to vector<8x8x8xf32>
    %23 = arith.subf %19, %22 : vector<8x8x8xf32>
    %24 = math.exp %23 : vector<8x8x8xf32>
    %cst_10 = arith.constant dense<0.000000e+00> : vector<8x8xf32>
    %25 = vector.multi_reduction <add>, %24, %cst_10 [2] : vector<8x8x8xf32> to vector<8x8xf32>
    %26 = vector.shape_cast %25 : vector<8x8xf32> to vector<8x8x1xf32>
    %27 = tpu.reciprocal %26 {approx = true} : vector<8x8x1xf32> -> vector<8x8x1xf32>
    %28 = vector.broadcast %27 : vector<8x8x1xf32> to vector<8x8x8xf32>
    %29 = arith.mulf %24, %28 : vector<8x8x8xf32>
    %30 = arith.truncf %29 : vector<8x8x8xf32> to vector<8x8x8xbf16>
    %cst_11 = arith.constant dense<0.000000e+00> : vector<8x8x8xf32>
    %31 = tpu.matmul %30, %18, %cst_11 {dimension_numbers = #tpu.dot_dimension_numbers<[2], [1], [1], [2], [0, 0, 0, 1, 1, 2], [0], [0]>} : vector<8x8x8xbf16>, vector<8x8x8xbf16>, vector<8x8x8xf32> -> vector<8x8x8xf32>
    %32 = tpu.transpose %31, [0, 2, 1] : vector<8x8x8xf32> -> vector<8x8x8xf32>
    %33 = vector.shape_cast %32 : vector<8x8x8xf32> to vector<2x4x8x8xf32>
    %34 = vector.shape_cast %33 : vector<2x4x8x8xf32> to vector<2x32x8xf32>
    %35 = tpu.transpose %34, [0, 2, 1] : vector<2x32x8xf32> -> vector<2x8x32xf32>
    %36 = vector.shape_cast %35 : vector<2x8x32xf32> to vector<16x32xf32>
    %37 = arith.truncf %36 : vector<16x32xf32> to vector<16x32xbf16>
    %c0_12 = arith.constant 0 : index
    %c0_13 = arith.constant 0 : index
    %38 = vector.load %arg4[%c0_12, %c0_13] : memref<32x128xbf16, #tpu.memory_space<vmem>>, vector<32x128xbf16>
    %cst_14 = arith.constant dense<0.000000e+00> : vector<16x128xf32>
    %39 = tpu.matmul %37, %38, %cst_14 {dimension_numbers = #tpu.dot_dimension_numbers<[1], [0], [0], [1], [0, 0, 1, 1], [], []>} : vector<16x32xbf16>, vector<32x128xbf16>, vector<16x128xf32> -> vector<16x128xf32>
    %c0_15 = arith.constant 0 : index
    %c0_16 = arith.constant 0 : index
    %40 = vector.load %arg5[%c0_15, %c0_16] : memref<1x128xf32, #tpu.memory_space<vmem>>, vector<1x128xf32>
    %41 = vector.broadcast %40 : vector<1x128xf32> to vector<16x128xf32>
    %42 = arith.addf %39, %41 : vector<16x128xf32>
    %c0_17 = arith.constant 0 : index
    %c0_18 = arith.constant 0 : index
    %43 = vector.load %arg6[%c0_17, %c0_18] : memref<16x128xf32, #tpu.memory_space<vmem>>, vector<16x128xf32>
    tpu.vector_store %arg6[%c0_17, %c0_18], %42 {strides = array<i32>} : memref<16x128xf32, #tpu.memory_space<vmem>>, vector<16x128xf32>,
    return
  }
  func.func @transform_0(%arg0: i32) -> (i32, i32, i32) {
    %c0_i32 = arith.constant 0 : i32
    %c0_i32_0 = arith.constant 0 : i32
    %c0_i32_1 = arith.constant 0 : i32
    return %arg0, %c0_i32, %c0_i32_0 : i32, i32, i32
  }
  func.func @transform_1(%arg0: i32) -> (i32, i32, i32) {
    %c0_i32 = arith.constant 0 : i32
    %c0_i32_0 = arith.constant 0 : i32
    %c0_i32_1 = arith.constant 0 : i32
    return %arg0, %c0_i32, %c0_i32_0 : i32, i32, i32
  }
  func.func @transform_2(%arg0: i32) -> (i32, i32, i32) {
    %c0_i32 = arith.constant 0 : i32
    %c0_i32_0 = arith.constant 0 : i32
    %c0_i32_1 = arith.constant 0 : i32
    return %arg0, %c0_i32, %c0_i32_0 : i32, i32, i32
  }
  func.func @transform_3(%arg0: i32) -> (i32, i32) {
    %c0_i32 = arith.constant 0 : i32
    %c0_i32_0 = arith.constant 0 : i32
    %c0_i32_1 = arith.constant 0 : i32
    return %c0_i32, %c0_i32_0 : i32, i32
  }
  func.func @transform_4(%arg0: i32) -> (i32, i32) {
    %c0_i32 = arith.constant 0 : i32
    %c0_i32_0 = arith.constant 0 : i32
    %c0_i32_1 = arith.constant 0 : i32
    return %c0_i32, %c0_i32_0 : i32, i32
  }
  func.func @transform_5(%arg0: i32) -> (i32, i32) {
    %c0_i32 = arith.constant 0 : i32
    %c0_i32_0 = arith.constant 0 : i32
    return %arg0, %c0_i32 : i32, i32
  }
}

</mosaic_0001>

<bundles_post_ra>
// kernel: tpu_custom_call.1
= control target key start
LH: loop header
LB: loop body
LE: loop exit
PB: predicated region body
PF: predicated region fallthrough
CT: control target
= control target key end

     0   :  { %10 = vsyncpa [#allocation3], 0  ;;  %s2723_s0 = inlined_call_operand.hbm [shape: f32[2,8,32], index: 0, kind: input, shape index: {}]   ;;  %s2724_s1 = inlined_call_operand.hbm [shape: f32[2,8,32], index: 1, kind: input, shape index: {}]   ;;  %s2725_s2 = inlined_call_operand.hbm [shape: f32[2,8,32], index: 2, kind: input, shape index: {}]   ;;  %s2726_s3 = inlined_call_operand.hbm [shape: bf16[32,128], index: 3, kind: input, shape index: {}]   ;;  %s2727_s4 = inlined_call_operand.vmem [shape: f32[1,128], index: 4, kind: input, shape index: {}]   ;;  %s2728_s5 = inlined_call_operand.hbm [shape: f32[16,128], index: 5, kind: output, shape index: {}]  }
   0x1   :  { %11 = vsyncpa [#allocation6], 0 }
   0x2   :  { %12 = vsyncpa [#allocation9], 0 }
   0x3   :  { %13 = vsyncpa [#allocation4], 0  ;;  %s2449_s18 = smov [#allocation5]   ;;  %s2450_s20 = smov [#allocation2]  }
   0x4   :  { %s31_s19 = sshll.u32 %s2449_s18, 4  ;;  %s19_s21 = sshll.u32 %s2450_s20, 4  ;;  %s32_s19 = int_to_ptr.vmem [resolvable:$true] %s31_s19  ;;  %s2490_s21 = int_to_ptr.vmem [resolvable:$true] %s19_s21 }
   0x5   :  { %s2331_s24 = scalar_lea.hbm %s2724_s1, 256 }
   0x6   :  { %p2332_p0 = scmp.ne.s32.totalorder %s2724_s1, %s2331_s24  ;;  %p2335_p1 = scmp.lt.u32.totalorder %s2331_s24, %s2724_s1 }
   0x8   :  { %p2337_p2 = pnand %p2335_p1, %p2332_p0 }
   0xa   :  { %2340 = shalt.err (!%p2337_p2)
}
   0xb   :  { %s2341_s29 = scalar_lea.vmem %s32_s19, 256  ;;  %p2346_p4 = scmp.lt.s32.totalorder %s32_s19, %s32_s19 }
   0xc   :  { %p2342_p3 = scmp.ne.s32.totalorder %s32_s19, %s2341_s29  ;;  %p2347_p5 = scmp.lt.s32.totalorder %s2341_s29, %s2341_s29 }
   0xe   :  { %p2348_p6 = por %p2347_p5, %p2346_p4 }
  0x10   :  { %p2349_p7 = pnand %p2348_p6, %p2342_p3 }
  0x12   :  { %2352 = shalt.err (!%p2349_p7)
}
  0x13   :  { %s2451_s30 = smov 128   ;;  %s2452_s6 = smov 8  }
  0x14   :  { %37 = dma.hbm_to_vmem [thread:$0]  %s2724_s1, 256, %s32_s19, [#allocation6], %s2451_s30, %s2451_s30, %s2452_s6  }
  0x15   :  { %s2353_s11 = scalar_lea.hbm %s2723_s0, 256 }
  0x16   :  { %p2354_p8 = scmp.ne.s32.totalorder %s2723_s0, %s2353_s11  ;;  %p2357_p9 = scmp.lt.u32.totalorder %s2353_s11, %s2723_s0 }
  0x18   :  { %p2359_p10 = pnand %p2357_p9, %p2354_p8 }
  0x1a   :  { %2362 = shalt.err (!%p2359_p10)
}
  0x1b   :  { %s2363_s16 = scalar_lea.vmem %s2490_s21, 256  ;;  %p2368_p12 = scmp.lt.s32.totalorder %s2490_s21, %s2490_s21 }
  0x1c   :  { %p2364_p11 = scmp.ne.s32.totalorder %s2490_s21, %s2363_s16  ;;  %p2369_p13 = scmp.lt.s32.totalorder %s2363_s16, %s2363_s16 }
  0x1e   :  { %p2370_p0 = por %p2369_p13, %p2368_p12 }
  0x20   :  { %p2371_p1 = pnand %p2370_p0, %p2364_p11 }
  0x22   :  { %2374 = shalt.err (!%p2371_p1)
}
  0x23   :  { %25 = dma.hbm_to_vmem [thread:$0]  %s2723_s0, 256, %s2490_s21, [#allocation3], %s2451_s30, %s2451_s30, %s2452_s6  }
  0x24   :  { %s2453_s18 = smov [#allocation7]   ;;  %s2454_s20 = smov [#allocation8]  }
  0x25   :  { %s43_s19 = sshll.u32 %s2453_s18, 4  ;;  %s55_s22 = sshll.u32 %s2454_s20, 4  ;;  %s44_s19 = int_to_ptr.vmem [resolvable:$true] %s43_s19  ;;  %s2527_s22 = int_to_ptr.vmem [resolvable:$true] %s55_s22 }
  0x26   :  { %s2375_s25 = scalar_lea.hbm %s2725_s2, 256 }
  0x27   :  { %p2376_p2 = scmp.ne.s32.totalorder %s2725_s2, %s2375_s25  ;;  %p2379_p3 = scmp.lt.u32.totalorder %s2375_s25, %s2725_s2 }
  0x29   :  { %p2381_p4 = pnand %p2379_p3, %p2376_p2 }
  0x2b   :  { %2384 = shalt.err (!%p2381_p4)
}
  0x2c   :  { %s2385_s0 = scalar_lea.vmem %s44_s19, 256  ;;  %p2390_p6 = scmp.lt.s32.totalorder %s44_s19, %s44_s19 }
  0x2d   :  { %p2386_p5 = scmp.ne.s32.totalorder %s44_s19, %s2385_s0  ;;  %p2391_p7 = scmp.lt.s32.totalorder %s2385_s0, %s2385_s0 }
  0x2f   :  { %p2392_p8 = por %p2391_p7, %p2390_p6 }
  0x31   :  { %p2393_p9 = pnand %p2392_p8, %p2386_p5 }
  0x33   :  { %2396 = shalt.err (!%p2393_p9)
}
  0x34   :  { %49 = dma.hbm_to_vmem [thread:$0]  %s2725_s2, 256, %s44_s19, [#allocation6], %s2451_s30, %s2451_s30, %s2452_s6  }
  0x35   :  { %s2397_s10 = scalar_lea.hbm %s2726_s3, 256 }
  0x36   :  { %p2398_p10 = scmp.ne.s32.totalorder %s2726_s3, %s2397_s10  ;;  %p2401_p11 = scmp.lt.u32.totalorder %s2397_s10, %s2726_s3 }
  0x38   :  { %p2403_p12 = pnand %p2401_p11, %p2398_p10 }
  0x3a   :  { %2406 = shalt.err (!%p2403_p12)
}
  0x3b   :  { %s2407_s15 = scalar_lea.vmem %s2527_s22, 256  ;;  %p2412_p0 = scmp.lt.s32.totalorder %s2527_s22, %s2527_s22 }
  0x3c   :  { %p2408_p13 = scmp.ne.s32.totalorder %s2527_s22, %s2407_s15  ;;  %p2413_p1 = scmp.lt.s32.totalorder %s2407_s15, %s2407_s15 }
  0x3e   :  { %p2414_p2 = por %p2413_p1, %p2412_p0 }
  0x40   :  { %p2415_p3 = pnand %p2414_p2, %p2408_p13 }
  0x42   :  { %2418 = shalt.err (!%p2415_p3)
}
  0x43   :  { %s2455_s2 = smov 64   ;;  %s2456_s16 = smov 4  }
  0x44   :  { %61 = dma.hbm_to_vmem [thread:$0]  %s2726_s3, 256, %s2527_s22, [#allocation9], %s2455_s2, %s2455_s2, %s2456_s16  }
  0x45   :  { %2441 = dma.done.wait [#allocation3], 256  }
  0x46   :  { %2442 = vsyncadd [#allocation3], 4294967040 }
  0x47   :  { %2443 = dma.done.wait [#allocation6], 512  }
  0x48   :  { %2444 = vsyncadd [#allocation6], 4294966784 }
  0x49   :  { %2445 = dma.done.wait [#allocation9], 256  }
  0x4a   :  { %2446 = vsyncadd [#allocation9], 4294967040  ;;  %v77_v0 = vld [vmem:[#allocation2] sm:$0xff]  ;;  %v409_v1 = vld [vmem:[#allocation5] sm:$0xff]  ;;  %v2457_v5 = vmov 0.0   ;;  %vm817_vm0 = vcmask 1043456  }
  0x4b   :  { %v79_v2 = vmul.f32 0.17677669, %v77_v0  ;;  %411 = vxpose.xlu1.b32.start.end [1/1] (short) (narrow) %v409_v1, 32  ;;  %v78_v3 = vld [vmem:[#allocation2 + $0x8] sm:$0xff]  ;;  %2112 = vmatprep.subr.bf16.mxu0 %v2457_v5  ;;  %vm2458_vm1 = vmmov 0   ;;  %v410_v17 = vld [vmem:[#allocation5 + $0x8] sm:$0xff] }
  0x4c   :  { %v80_v4 = vmul.f32 0.17677669, %v78_v3  ;;  %2118 = vmatprep.subr.bf16.mxu1 %v2457_v5  ;;  %2114 = vmatprep.mubr.msk.bf16.mxu0 %vm2458_vm1, %v2457_v5  ;;  %v483_v22 = vld [vmem:[#allocation7] sm:$0xff]  ;;  %v484_v23 = vld [vmem:[#allocation7 + $0x8] sm:$0xff]  ;;  %vm813_vm2 = vcmask 64512   ;;  %vm1991_vm3 = vcmask 261120  }
  0x4d   :  { %81 = vxpose.xlu0.b32.start.end [1/1] (short) (narrow) %v79_v2, 32  ;;  %2120 = vmatprep.mubr.msk.bf16.mxu1 %vm2458_vm1, %v2457_v5  ;;  %v2234_v24 = vpack.i.bf16 %v484_v23, %v483_v22  ;;  %s2459_s19 = smov [#allocation10]  }
  0x4e   :  { %s2043_s20 = sshll.u32 %s2459_s19, 4  ;;  %s2044_s20 = int_to_ptr.vmem [resolvable:$true] %s2043_s20 }
  0x4f   :  { %s2419_s22 = scalar_lea.vmem %s2044_s20, 256  ;;  %p2424_p5 = scmp.lt.s32.totalorder %s2044_s20, %s2044_s20 }
  0x50   :  { %p2420_p4 = scmp.ne.s32.totalorder %s2044_s20, %s2419_s22  ;;  %p2425_p6 = scmp.lt.s32.totalorder %s2419_s22, %s2419_s22 }
  0x52   :  { %p2426_p7 = por %p2425_p6, %p2424_p5 }
  0x54   :  { %p2427_p8 = pnand %p2426_p7, %p2420_p4 }
  0x5a   :  { %113 = vxpose.xlu0.b32.start.end [1/1] (short) (narrow) %v80_v4, 32 }
  0xcb   :  { %v427_v6 = vpop.trf.xlu1 }
  0xcc   :  { %v475_v7 = vpack.c.bf16 %v427_v6, %v427_v6 }
  0xcd   :  { %v97_v8 = vpop.trf.xlu0 }
  0xce   :  { %145 = vxpose.xlu1.b32.start.end [1/1] (short) (narrow) %v97_v8, 8  ;;  %v819_v9 = vsel %vm817_vm0, %v475_v7, 0 }
  0xcf   :  { %v428_v10 = vpop.trf.xlu1  ;;  %2113 = vmatpush3.bf16.msra.mxu0 %v819_v9 }
  0xd0   :  { %v476_v11 = vpack.c.bf16 %v428_v10, %v428_v10  ;;  %2124 = vmatprep.subr.bf16.mxu0 %v2457_v5 }
  0xd1   :  { %v98_v12 = vpop.trf.xlu0 }
  0xd2   :  { %177 = vxpose.xlu0.b32.start.end [1/1] (short) (narrow) %v98_v12, 8  ;;  %v865_v13 = vsel %vm817_vm0, %v476_v11, 0 }
  0xd3   :  { %2119 = vmatpush3.bf16.msra.mxu1 %v865_v13  ;;  %v429_v25 = vpop.trf.xlu1 }
  0xd4   :  { %2130 = vmatprep.subr.bf16.mxu1 %v2457_v5  ;;  %v477_v27 = vpack.c.bf16 %v429_v25, %v429_v25 }
  0xd5   :  { %v99_v14 = vpop.trf.xlu0 }
  0xd6   :  { %v911_v30 = vsel %vm817_vm0, %v477_v27, 0 }
  0xd7   :  { %v430_v26 = vpop.trf.xlu1 }
  0xd8   :  { %v478_v31 = vpack.c.bf16 %v430_v26, %v430_v26 }
  0xd9   :  { %v100_v15 = vpop.trf.xlu0 }
  0xda   :  { %v2227_v16 = vpack.i.bf16 %v100_v15, %v99_v14  ;;  %v957_v34 = vsel %vm817_vm0, %v478_v31, 0 }
  0xdc   :  { %2228 = vxpose.xlu1.b32.start.end [1/1] (short) (narrow) %v2227_v16, 8 }
  0xdd   :  { %v129_v18 = vpop.trf.xlu0 }
  0xe0   :  { %443 = vxpose.xlu1.b32.start.end [1/1] (short) (narrow) %v410_v17, 32 }
  0xe1   :  { %v130_v19 = vpop.trf.xlu0 }
  0xe2   :  { %305 = vxpose.xlu0.b32.start.end [1/1] (short) (narrow) %v130_v19, 8 }
  0xe5   :  { %v131_v20 = vpop.trf.xlu0 }
  0xe6   :  { %337 = vxpose.xlu0.b32.start.end [1/1] (short) (narrow) %v131_v20, 8 }
  0xe9   :  { %v132_v21 = vpop.trf.xlu0 }
  0xea   :  { %369 = vxpose.xlu0.b32.start.end [1/1] (short) (narrow) %v132_v21, 8 }
  0xed   :  { %273 = vxpose.xlu1.b32.start.end [1/1] (short) (narrow) %v129_v18, 8 }
  0xf1   :  { %2235 = vxpose.xlu1.b32.start.end [1/1] (short) (narrow) %v2234_v24, 32 }
 0x14e   :  { %v161_v28 = vpop.trf.xlu1 }
 0x14f   :  { %v401_v29 = vpack.c.bf16 %v161_v28, %v161_v28 }
 0x151   :  { %2115 = vmatmul.mubr.msk.bf16.vlgmr.msra.gmra.mrb[0].mxu0 %vm813_vm2, %v401_v29 }
 0x152   :  { %2125 = vmatpush3.bf16.msra.mxu0 %v911_v30  ;;  %v193_v32 = vpop.trf.xlu0  ;;  %2126 = vmatprep.mubr.msk.bf16.mxu0 %vm2458_vm1, %v2457_v5 }
 0x153   :  { %v402_v33 = vpack.c.bf16 %v193_v32, %v193_v32  ;;  %2136 = vmatprep.subr.bf16.mxu0 %v2457_v5 }
 0x155   :  { %2121 = vmatmul.mubr.msk.bf16.vlgmr.msra.gmra.mrb[0].mxu1 %vm813_vm2, %v402_v33 }
 0x156   :  { %2131 = vmatpush3.bf16.msra.mxu1 %v957_v34  ;;  %2132 = vmatprep.mubr.msk.bf16.mxu1 %vm2458_vm1, %v2457_v5 }
 0x157   :  { %2142 = vmatprep.subr.bf16.mxu1 %v2457_v5 }
 0x15c   :  { %v2229_v35 = vpop.trf.xlu1 }
 0x15d   :  { %v2233_v36 = vunpack.i.h.bf16 %v2229_v35  ;;  %v2230_v37 = vunpack.i.l.bf16 %v2229_v35 }
 0x15f   :  { %v404_v38 = vpack.c.bf16 %v2233_v36, %v2233_v36  ;;  %v403_v39 = vpack.c.bf16 %v2230_v37, %v2230_v37 }
 0x160   :  { %v459_v40 = vpop.trf.xlu1 }
 0x161   :  { %v479_v41 = vpack.c.bf16 %v459_v40, %v459_v40  ;;  %2127 = vmatmul.mubr.msk.bf16.vlgmr.msra.gmra.mrb[4].mxu0 %vm813_vm2, %v403_v39  ;;  %2133 = vmatmul.mubr.msk.bf16.vlgmr.msra.gmra.mrb[4].mxu1 %vm813_vm2, %v404_v38 }
 0x162   :  { %v321_v42 = vpop.trf.xlu0  ;;  %2144 = vmatprep.mubr.msk.bf16.mxu1 %vm2458_vm1, %v2457_v5  ;;  %2138 = vmatprep.mubr.msk.bf16.mxu0 %vm2458_vm1, %v2457_v5 }
 0x163   :  { %v1003_v43 = vsel %vm817_vm0, %v479_v41, 0  ;;  %v406_v48 = vpack.c.bf16 %v321_v42, %v321_v42 }
 0x164   :  { %v460_v44 = vpop.trf.xlu1  ;;  %2137 = vmatpush3.bf16.msra.mxu0 %v1003_v43 }
 0x165   :  { %v480_v45 = vpack.c.bf16 %v460_v44, %v460_v44  ;;  %2148 = vmatprep.subr.bf16.mxu0 %v2457_v5 }
 0x166   :  { %v353_v46 = vpop.trf.xlu0 }
 0x167   :  { %v1049_v47 = vsel %vm817_vm0, %v480_v45, 0  ;;  %v407_v61 = vpack.c.bf16 %v353_v46, %v353_v46 }
 0x168   :  { %v461_v49 = vpop.trf.xlu1  ;;  %2143 = vmatpush3.bf16.msra.mxu1 %v1049_v47 }
 0x169   :  { %2154 = vmatprep.subr.bf16.mxu1 %v2457_v5  ;;  %v481_v52 = vpack.c.bf16 %v461_v49, %v461_v49 }
 0x16a   :  { %v385_v51 = vpop.trf.xlu0 }
 0x16b   :  { %2145 = vmatmul.mubr.msk.bf16.vlgmr.msra.gmra.mrb[8].mxu1 %vm813_vm2, %v406_v48  ;;  %v408_v55 = vpack.c.bf16 %v385_v51, %v385_v51  ;;  %v1095_v57 = vsel %vm817_vm0, %v481_v52, 0 }
 0x16c   :  { %v462_v50 = vpop.trf.xlu1  ;;  %2156 = vmatprep.mubr.msk.bf16.mxu1 %vm2458_vm1, %v2457_v5 }
 0x16d   :  { %v482_v53 = vpack.c.bf16 %v462_v50, %v462_v50 }
 0x16f   :  { %v1141_v54 = vsel %vm817_vm0, %v482_v53, 0 }
 0x170   :  { %v289_v56 = vpop.trf.xlu1  ;;  %2155 = vmatpush3.bf16.msra.mxu1 %v1141_v54 }
 0x171   :  { %v405_v58 = vpack.c.bf16 %v289_v56, %v289_v56  ;;  %2166 = vmatprep.subr.bf16.mxu1 %v2457_v5 }
 0x173   :  { %2139 = vmatmul.mubr.msk.bf16.vlgmr.msra.gmra.mrb[8].mxu0 %vm813_vm2, %v405_v58  ;;  %2157 = vmatmul.mubr.msk.bf16.vlgmr.msra.gmra.mrb[12].mxu1 %vm813_vm2, %v408_v55 }
 0x174   :  { %2149 = vmatpush3.bf16.msra.mxu0 %v1095_v57  ;;  %2150 = vmatprep.mubr.msk.bf16.mxu0 %vm2458_vm1, %v2457_v5  ;;  %v2601_v59 = vpop.trf.xlu1 }
 0x175   :  { %v2237_v60 = vunpack.i.l.bf16 %v2601_v59  ;;  %2160 = vmatprep.subr.bf16.mxu0 %v2457_v5  ;;  %2168 = vmatprep.mubr.msk.bf16.mxu1 %vm2458_vm1, %v2457_v5  ;;  %v2240_v57 = vunpack.i.h.bf16 %v2601_v59 }
 0x177   :  { %549 = vxpose.xlu0.b32.start.end [1/1] (short) (narrow) %v2237_v60, 8 }
 0x178   :  { %v2607_v62 = vpop.trf.xlu1 }
 0x179   :  { %v2242_v58 = vunpack.i.l.bf16 %v2607_v62 }
 0x17b   :  { %2151 = vmatmul.mubr.msk.bf16.vlgmr.msra.gmra.mrb[12].mxu0 %vm813_vm2, %v407_v61 }
 0x17c   :  { %v2610_v63 = vpop.trf.xlu1  ;;  %2162 = vmatprep.mubr.msk.bf16.mxu0 %vm2458_vm1, %v2457_v5 }
 0x17d   :  { %v2247_v0 = vunpack.i.l.bf16 %v2610_v63 }
 0x17f   :  { %613 = vxpose.xlu0.b32.start.end [1/1] (short) (narrow) %v2247_v0, 8 }
 0x180   :  { %v2615_v1 = vpop.trf.xlu1 }
 0x1f7   :  { %v565_v2 = vpop.trf.xlu0 }
 0x1f8   :  { %v805_v3 = vpack.c.bf16 %v565_v2, %v565_v2 }
 0x1fa   :  { %v1283_v4 = vsel %vm817_vm0, %v805_v3, 0 }
 0x1fb   :  { %2161 = vmatpush3.bf16.msra.mxu0 %v1283_v4 }
 0x1fc   :  { %2172 = vmatprep.subr.bf16.mxu0 %v2457_v5 }
 0x1ff   :  { %v2627_v46 = vpop.trf.xlu0 }
 0x224   :  { %v855_v6 = vpop.f32.mrb[0].mxu0 }
 0x225   :  { %v2116_v7 = vpop.f32.mrb[1].mxu0  ;;  %v1183_v8 = vsel %vm813_vm2, %v855_v6, -inf }
 0x226   :  { %v858_v9 = vpop.f32.mrb[2].mxu0  ;;  %1184 = vmax.xlane.f32.xlu1 %v1183_v8 }
 0x227   :  { %v2117_v10 = vpop.f32.mrb[3].mxu0 }
 0x228   :  { %v901_v11 = vpop.f32.mrb[0].mxu1 }
 0x229   :  { %v2122_v12 = vpop.f32.mrb[1].mxu1  ;;  %v1186_v13 = vsel %vm813_vm2, %v901_v11, -inf }
 0x22a   :  { %1187 = vmax.xlane.f32.xlu0 %v1186_v13  ;;  %v904_v14 = vpop.f32.mrb[2].mxu1 }
 0x22b   :  { %v2123_v15 = vpop.f32.mrb[3].mxu1 }
 0x234   :  { %v947_v16 = vpop.f32.mrb[4].mxu0  ;;  %v993_v17 = vpop.f32.mrb[4].mxu1 }
 0x235   :  { %v1189_v18 = vsel %vm813_vm2, %v947_v16, -inf  ;;  %v2134_v19 = vpop.f32.mrb[5].mxu1  ;;  %v2128_v20 = vpop.f32.mrb[5].mxu0  ;;  %v1192_v23 = vsel %vm813_vm2, %v993_v17, -inf }
 0x236   :  { %1190 = vmax.xlane.f32.xlu1 %v1189_v18  ;;  %v996_v21 = vpop.f32.mrb[6].mxu1  ;;  %v950_v22 = vpop.f32.mrb[6].mxu0 }
 0x237   :  { %v2135_v24 = vpop.f32.mrb[7].mxu1  ;;  %v2129_v25 = vpop.f32.mrb[7].mxu0 }
 0x23a   :  { %1193 = vmax.xlane.f32.xlu1 %v1192_v23 }
 0x23e   :  { %v1085_v26 = vpop.f32.mrb[8].mxu1 }
 0x23f   :  { %v1198_v27 = vsel %vm813_vm2, %v1085_v26, -inf  ;;  %v2146_v28 = vpop.f32.mrb[9].mxu1 }
 0x240   :  { %1199 = vmax.xlane.f32.xlu0 %v1198_v27  ;;  %v1088_v29 = vpop.f32.mrb[10].mxu1 }
 0x241   :  { %v2147_v30 = vpop.f32.mrb[11].mxu1  ;;  %v2252_v29 = vunpack.i.l.bf16 %v2615_v1 }
 0x246   :  { %v1039_v31 = vpop.f32.mrb[8].mxu0  ;;  %v1177_v32 = vpop.f32.mrb[12].mxu1 }
 0x247   :  { %v1195_v33 = vsel %vm813_vm2, %v1039_v31, -inf  ;;  %v1204_v34 = vsel %vm813_vm2, %v1177_v32, -inf  ;;  %v2140_v35 = vpop.f32.mrb[9].mxu0  ;;  %v2158_v36 = vpop.f32.mrb[13].mxu1 }
 0x248   :  { %1196 = vmax.xlane.f32.xlu1 %v1195_v33  ;;  %1205 = vmax.xlane.f32.xlu0 %v1204_v34  ;;  %v1042_v37 = vpop.f32.mrb[10].mxu0  ;;  %v1180_v38 = vpop.f32.mrb[14].mxu1  ;;  %v807_v34 = vpack.c.bf16 %v2627_v46, %v2627_v46  ;;  %v2250_v36 = vunpack.i.h.bf16 %v2610_v63 }
 0x249   :  { %v2141_v39 = vpop.f32.mrb[11].mxu0  ;;  %v2159_v40 = vpop.f32.mrb[15].mxu1 }
 0x24a   :  { %v1375_v38 = vsel %vm817_vm0, %v807_v34, 0 }
 0x24e   :  { %v1131_v41 = vpop.f32.mrb[12].mxu0 }
 0x24f   :  { %v1201_v42 = vsel %vm813_vm2, %v1131_v41, -inf  ;;  %v2152_v43 = vpop.f32.mrb[13].mxu0 }
 0x250   :  { %1202 = vmax.xlane.f32.xlu1 %v1201_v42  ;;  %v1134_v44 = vpop.f32.mrb[14].mxu0 }
 0x251   :  { %v2153_v45 = vpop.f32.mrb[15].mxu0 }
 0x2b3   :  { %v1185_v47 = vpop.xlane.xlu1 %1184 }
 0x2b4   :  { %v1207_v48 = vsub.f32 %v855_v6, %v1185_v47 }
 0x2b6   :  { %v1215_v49 = vmul.f32 1.442695, %v1207_v48 }
 0x2b7   :  { %v1188_v50 = vpop.xlane.xlu0 %1187 }
 0x2b8   :  { %2299 = vpow2.f32 %v1215_v49  ;;  %v1208_v51 = vsub.f32 %v901_v11, %v1188_v50 }
 0x2ba   :  { %v1217_v52 = vmul.f32 1.442695, %v1208_v51 }
 0x2bc   :  { %2301 = vpow2.f32 %v1217_v52 }
 0x2c2   :  { %v2300_v53 = vpop.eup %2299 }
 0x2c3   :  { %v1231_v54 = vsel %vm813_vm2, %v2300_v53, 0.0  ;;  %v1191_v60 = vpop.xlane.xlu1 %1190 }
 0x2c4   :  { %1232 = vadd.xlane.f32.xlu1 %v1231_v54  ;;  %v1209_v61 = vsub.f32 %v947_v16, %v1191_v60 }
 0x2c6   :  { %v2630_v55 = vpop.eup %2301  ;;  %v1219_v2 = vmul.f32 1.442695, %v1209_v61 }
 0x2c7   :  { %v1234_v56 = vsel %vm813_vm2, %v2630_v55, 0.0  ;;  %v1194_v0 = vpop.xlane.xlu1 %1193 }
 0x2c8   :  { %1235 = vadd.xlane.f32.xlu0 %v1234_v56  ;;  %v1210_v3 = vsub.f32 %v993_v17, %v1194_v0  ;;  %2303 = vpow2.f32 %v1219_v2 }
 0x2ca   :  { %v1221_v6 = vmul.f32 1.442695, %v1210_v3 }
 0x2cc   :  { %2305 = vpow2.f32 %v1221_v6 }
 0x2cd   :  { %v1200_v8 = vpop.xlane.xlu0 %1199 }
 0x2ce   :  { %v1212_v9 = vsub.f32 %v1085_v26, %v1200_v8 }
 0x2d0   :  { %v1225_v12 = vmul.f32 1.442695, %v1212_v9 }
 0x2d2   :  { %v2636_v14 = vpop.eup %2303 }
 0x2d3   :  { %v1237_v17 = vsel %vm813_vm2, %v2636_v14, 0.0 }
 0x2d5   :  { %v1197_v4 = vpop.xlane.xlu1 %1196  ;;  %v1206_v13 = vpop.xlane.xlu0 %1205 }
 0x2d6   :  { %v1211_v7 = vsub.f32 %v1039_v31, %v1197_v4  ;;  %v1214_v15 = vsub.f32 %v1177_v32, %v1206_v13  ;;  %v2640_v18 = vpop.eup %2305  ;;  %v2245_v31 = vunpack.i.h.bf16 %v2607_v62  ;;  %v2255_v32 = vunpack.i.h.bf16 %v2615_v1 }
 0x2d7   :  { %v1240_v20 = vsel %vm813_vm2, %v2640_v18, 0.0 }
 0x2d8   :  { %v1223_v10 = vmul.f32 1.442695, %v1211_v7  ;;  %v1229_v19 = vmul.f32 1.442695, %v1214_v15 }
 0x2da   :  { %2307 = vpow2.f32 %v1223_v10 }
 0x2db   :  { %2309 = vpow2.f32 %v1225_v12 }
 0x2dd   :  { %v1203_v11 = vpop.xlane.xlu1 %1202 }
 0x2de   :  { %v1213_v59 = vsub.f32 %v1131_v41, %v1203_v11 }
 0x2e0   :  { %v1227_v16 = vmul.f32 1.442695, %v1213_v59 }
 0x2e2   :  { %2311 = vpow2.f32 %v1227_v16 }
 0x2e3   :  { %2313 = vpow2.f32 %v1229_v19 }
 0x2e4   :  { %v2308_v21 = vpop.eup %2307 }
 0x2e5   :  { %v1243_v22 = vsel %vm813_vm2, %v2308_v21, 0.0  ;;  %v2645_v23 = vpop.eup %2309 }
 0x2e6   :  { %v1246_v24 = vsel %vm813_vm2, %v2645_v23, 0.0 }
 0x2ec   :  { %v2649_v25 = vpop.eup %2311 }
 0x2ed   :  { %v1249_v26 = vsel %vm813_vm2, %v2649_v25, 0.0  ;;  %v2653_v27 = vpop.eup %2313 }
 0x2ee   :  { %v1252_v28 = vsel %vm813_vm2, %v2653_v27, 0.0 }
 0x2f5   :  { %677 = vxpose.xlu0.b32.start.end [1/1] (short) (narrow) %v2240_v57, 8 }
 0x2f7   :  { %581 = vxpose.xlu1.b32.start.end [1/1] (short) (narrow) %v2242_v58, 8 }
 0x31e   :  { %1238 = vadd.xlane.f32.xlu1 %v1237_v17 }
 0x322   :  { %1241 = vadd.xlane.f32.xlu0 %v1240_v20 }
 0x326   :  { %1244 = vadd.xlane.f32.xlu0 %v1243_v22 }
 0x32a   :  { %1247 = vadd.xlane.f32.xlu0 %v1246_v24 }
 0x32e   :  { %1250 = vadd.xlane.f32.xlu0 %v1249_v26 }
 0x332   :  { %1253 = vadd.xlane.f32.xlu0 %v1252_v28 }
 0x351   :  { %645 = vxpose.xlu1.b32.start.end [1/1] (short) (narrow) %v2252_v29, 8  ;;  %v1233_v30 = vpop.xlane.xlu1 %1232 }
 0x352   :  { %2315 = vrcp.f32 %v1233_v30 }
 0x355   :  { %709 = vxpose.xlu1.b32.start.end [1/1] (short) (narrow) %v2245_v31, 8  ;;  %v1236_v62 = vpop.xlane.xlu0 %1235 }
 0x356   :  { %2317 = vrcp.f32 %v1236_v62 }
 0x359   :  { %773 = vxpose.xlu1.b32.start.end [1/1] (short) (narrow) %v2255_v32, 8 }
 0x35c   :  { %v2316_v33 = vpop.eup %2315 }
 0x35d   :  { %v1263_v35 = vmul.f32 %v2316_v33, %v2300_v53 }
 0x35f   :  { %741 = vxpose.xlu0.b32.start.end [1/1] (short) (narrow) %v2250_v36, 8  ;;  %v1271_v37 = vpack.c.bf16 %v1263_v35, %v1263_v35 }
 0x360   :  { %v2318_v1 = vpop.eup %2317 }
 0x361   :  { %2163 = vmatmul.mubr.msk.bf16.vlgmr.msra.gmra.mrb[16].mxu0 %vm813_vm2, %v1271_v37  ;;  %v1264_v40 = vmul.f32 %v2318_v1, %v2630_v55 }
 0x362   :  { %2173 = vmatpush3.bf16.msra.mxu0 %v1375_v38  ;;  %2174 = vmatprep.mubr.msk.bf16.mxu0 %vm2458_vm1, %v2457_v5 }
 0x363   :  { %2184 = vmatprep.subr.bf16.mxu0 %v2457_v5  ;;  %v1272_v42 = vpack.c.bf16 %v1264_v40, %v1264_v40 }
 0x375   :  { %v693_v43 = vpop.trf.xlu0 }
 0x376   :  { %v809_v47 = vpack.c.bf16 %v693_v43, %v693_v43 }
 0x377   :  { %v597_v39 = vpop.trf.xlu1 }
 0x378   :  { %v806_v41 = vpack.c.bf16 %v597_v39, %v597_v39  ;;  %v1467_v50 = vsel %vm817_vm0, %v809_v47, 0 }
 0x37a   :  { %v1329_v63 = vsel %vm817_vm0, %v806_v41, 0 }
 0x37b   :  { %2167 = vmatpush3.bf16.msra.mxu1 %v1329_v63 }
 0x37c   :  { %2178 = vmatprep.subr.bf16.mxu1 %v2457_v5 }
 0x37e   :  { %2169 = vmatmul.mubr.msk.bf16.vlgmr.msra.gmra.mrb[16].mxu1 %vm813_vm2, %v1272_v42 }
 0x37f   :  { %2180 = vmatprep.mubr.msk.bf16.mxu1 %vm2458_vm1, %v2457_v5 }
 0x3ab   :  { %v1239_v44 = vpop.xlane.xlu1 %1238 }
 0x3ac   :  { %2319 = vrcp.f32 %v1239_v44 }
 0x3af   :  { %v1242_v45 = vpop.xlane.xlu0 %1241 }
 0x3b3   :  { %v1245_v46 = vpop.xlane.xlu0 %1244 }
 0x3b4   :  { %2321 = vrcp.f32 %v1245_v46 }
 0x3b5   :  { %2323 = vrcp.f32 %v1242_v45 }
 0x3b6   :  { %v2320_v48 = vpop.eup %2319 }
 0x3b7   :  { %v1265_v49 = vmul.f32 %v2320_v48, %v2636_v14  ;;  %v1248_v55 = vpop.xlane.xlu0 %1247 }
 0x3b8   :  { %2325 = vrcp.f32 %v1248_v55  ;;  %v2297_v55 = vld [vmem:[#allocation8] sm:$0xff]  }
 0x3b9   :  { %v1273_v51 = vpack.c.bf16 %v1265_v49, %v1265_v49 }
 0x3bb   :  { %2175 = vmatmul.mubr.msk.bf16.vlgmr.msra.gmra.mrb[20].mxu0 %vm813_vm2, %v1273_v51  ;;  %v1251_v56 = vpop.xlane.xlu0 %1250 }
 0x3bc   :  { %2185 = vmatpush3.bf16.msra.mxu0 %v1467_v50  ;;  %2186 = vmatprep.mubr.msk.bf16.mxu0 %vm2458_vm1, %v2457_v5  ;;  %2327 = vrcp.f32 %v1251_v56 }
 0x3bd   :  { %2196 = vmatprep.subr.bf16.mxu0 %v2457_v5 }
 0x3be   :  { %v2322_v52 = vpop.eup %2321 }
 0x3bf   :  { %v1267_v53 = vmul.f32 %v2322_v52, %v2308_v21  ;;  %v2324_v57 = vpop.eup %2323  ;;  %v1254_v61 = vpop.xlane.xlu0 %1253 }
 0x3c0   :  { %v1266_v60 = vmul.f32 %v2324_v57, %v2640_v18  ;;  %2329 = vrcp.f32 %v1254_v61 }
 0x3c1   :  { %v1275_v54 = vpack.c.bf16 %v1267_v53, %v1267_v53 }
 0x3c2   :  { %v1274_v4 = vpack.c.bf16 %v1266_v60, %v1266_v60  ;;  %v2326_v7 = vpop.eup %2325 }
 0x3c3   :  { %2187 = vmatmul.mubr.msk.bf16.vlgmr.msra.gmra.mrb[24].mxu0 %vm813_vm2, %v1275_v54  ;;  %v1268_v10 = vmul.f32 %v2326_v7, %v2645_v23 }
 0x3c4   :  { %2198 = vmatprep.mubr.msk.bf16.mxu0 %vm2458_vm1, %v2457_v5 }
 0x3c5   :  { %v1276_v59 = vpack.c.bf16 %v1268_v10, %v1268_v10 }
 0x3c6   :  { %v2328_v12 = vpop.eup %2327 }
 0x3c7   :  { %v1269_v16 = vmul.f32 %v2328_v12, %v2649_v25 }
 0x3c9   :  { %v1277_v20 = vpack.c.bf16 %v1269_v16, %v1269_v16 }
 0x3ca   :  { %v2330_v14 = vpop.eup %2329 }
 0x3cb   :  { %v1270_v18 = vmul.f32 %v2330_v14, %v2653_v27 }
 0x3cd   :  { %v1278_v21 = vpack.c.bf16 %v1270_v18, %v1270_v18 }
 0x3d1   :  { %v661_v58 = vpop.trf.xlu1 }
 0x3d2   :  { %v808_v0 = vpack.c.bf16 %v661_v58, %v661_v58  ;;  %v2298_v58 = vld [vmem:[#allocation8 + $0x8] sm:$0xff]  }
 0x3d4   :  { %v1421_v2 = vsel %vm817_vm0, %v808_v0, 0 }
 0x3d5   :  { %2179 = vmatpush3.bf16.msra.mxu1 %v1421_v2  ;;  %v725_v3 = vpop.trf.xlu1 }
 0x3d6   :  { %v810_v6 = vpack.c.bf16 %v725_v3, %v725_v3  ;;  %2190 = vmatprep.subr.bf16.mxu1 %v2457_v5 }
 0x3d8   :  { %2181 = vmatmul.mubr.msk.bf16.vlgmr.msra.gmra.mrb[20].mxu1 %vm813_vm2, %v1274_v4  ;;  %v1513_v8 = vsel %vm817_vm0, %v810_v6, 0 }
 0x3d9   :  { %2191 = vmatpush3.bf16.msra.mxu1 %v1513_v8  ;;  %2192 = vmatprep.mubr.msk.bf16.mxu1 %vm2458_vm1, %v2457_v5  ;;  %v789_v9 = vpop.trf.xlu1 }
 0x3da   :  { %v812_v11 = vpack.c.bf16 %v789_v9, %v789_v9  ;;  %2202 = vmatprep.subr.bf16.mxu1 %v2457_v5 }
 0x3dc   :  { %v1605_v13 = vsel %vm817_vm0, %v812_v11, 0 }
 0x3df   :  { %v757_v15 = vpop.trf.xlu0 }
 0x3e0   :  { %v811_v17 = vpack.c.bf16 %v757_v15, %v757_v15  ;;  %2193 = vmatmul.mubr.msk.bf16.vlgmr.msra.gmra.mrb[24].mxu1 %vm813_vm2, %v1276_v59 }
 0x3e1   :  { %2203 = vmatpush3.bf16.msra.mxu1 %v1605_v13  ;;  %2204 = vmatprep.mubr.msk.bf16.mxu1 %vm2458_vm1, %v2457_v5 }
 0x3e2   :  { %v1559_v19 = vsel %vm817_vm0, %v811_v17, 0 }
 0x3e3   :  { %2197 = vmatpush3.bf16.msra.mxu0 %v1559_v19 }
 0x3e4   :  { %2208 = vmatprep.subr.bf16.mxu0 %v2457_v5 }
 0x3e6   :  { %2199 = vmatmul.mubr.msk.bf16.vlgmr.msra.gmra.mrb[28].mxu0 %vm813_vm2, %v1277_v20 }
 0x3e7   :  { %2212 = vmatprep.mubr.msk.bf16.mxu0 %vm2458_vm1, %v2457_v5  ;;  %2209 = vmatpush3.bf16.msra.mxu0 %v2297_v55 }
 0x3e8   :  { %2205 = vmatmul.mubr.msk.bf16.vlgmr.msra.gmra.mrb[28].mxu1 %vm813_vm2, %v1278_v21  ;;  %2210 = vmatprep.subr.bf16.mxu0 %v2457_v5  ;;  %v2073_v5 = vld [vmem:[%s2727_s4] ss:$0 sm:$0xff] }
 0x3eb   :  { %2211 = vmatpush3.bf16.msra.mxu0 %v2298_v58 }
 0x434   :  { %v1319_v22 = vpop.f32.mrb[16].mxu0 }
 0x435   :  { %v2164_v23 = vpop.f32.mrb[17].mxu0 }
 0x436   :  { %v1322_v24 = vpop.f32.mrb[18].mxu0 }
 0x437   :  { %v2165_v25 = vpop.f32.mrb[19].mxu0 }
 0x451   :  { %v1365_v26 = vpop.f32.mrb[16].mxu1 }
 0x452   :  { %v2170_v27 = vpop.f32.mrb[17].mxu1 }
 0x453   :  { %v1368_v28 = vpop.f32.mrb[18].mxu1 }
 0x454   :  { %v2171_v29 = vpop.f32.mrb[19].mxu1 }
 0x48e   :  { %v1411_v30 = vpop.f32.mrb[20].mxu0 }
 0x48f   :  { %v2176_v31 = vpop.f32.mrb[21].mxu0 }
 0x490   :  { %v1414_v32 = vpop.f32.mrb[22].mxu0 }
 0x491   :  { %v2177_v33 = vpop.f32.mrb[23].mxu0 }
 0x496   :  { %v1503_v34 = vpop.f32.mrb[24].mxu0 }
 0x497   :  { %v2256_v35 = vpack.i.bf16 %v1503_v34, %v1319_v22  ;;  %v2188_v36 = vpop.f32.mrb[25].mxu0 }
 0x498   :  { %v1506_v37 = vpop.f32.mrb[26].mxu0 }
 0x499   :  { %2257 = vxpose.xlu0.b32.start.end [1/1] (short) (narrow) %v2256_v35, 8  ;;  %v2189_v38 = vpop.f32.mrb[27].mxu0 }
 0x4ab   :  { %v1457_v62 = vpop.f32.mrb[20].mxu1 }
 0x4ac   :  { %v2182_v1 = vpop.f32.mrb[21].mxu1 }
 0x4ad   :  { %v1460_v39 = vpop.f32.mrb[22].mxu1 }
 0x4ae   :  { %v2183_v40 = vpop.f32.mrb[23].mxu1 }
 0x4b3   :  { %v1549_v41 = vpop.f32.mrb[24].mxu1 }
 0x4b4   :  { %v2263_v63 = vpack.i.bf16 %v1549_v41, %v1365_v26  ;;  %v2194_v42 = vpop.f32.mrb[25].mxu1 }
 0x4b5   :  { %v1552_v43 = vpop.f32.mrb[26].mxu1 }
 0x4b6   :  { %2264 = vxpose.xlu1.b32.start.end [1/1] (short) (narrow) %v2263_v63, 8  ;;  %v2195_v44 = vpop.f32.mrb[27].mxu1 }
 0x4b9   :  { %v1595_v45 = vpop.f32.mrb[28].mxu0 }
 0x4ba   :  { %v2270_v46 = vpack.i.bf16 %v1595_v45, %v1411_v30  ;;  %v2200_v47 = vpop.f32.mrb[29].mxu0 }
 0x4bb   :  { %v1598_v48 = vpop.f32.mrb[30].mxu0  ;;  %v1641_v49 = vpop.f32.mrb[28].mxu1 }
 0x4bc   :  { %v2277_v50 = vpack.i.bf16 %v1641_v49, %v1457_v62  ;;  %v2206_v51 = vpop.f32.mrb[29].mxu1  ;;  %2271 = vxpose.xlu0.b32.start.end [1/1] (short) (narrow) %v2270_v46, 8  ;;  %v2201_v52 = vpop.f32.mrb[31].mxu0 }
 0x4bd   :  { %v1644_v53 = vpop.f32.mrb[30].mxu1 }
 0x4be   :  { %2278 = vxpose.xlu1.b32.start.end [1/1] (short) (narrow) %v2277_v50, 8  ;;  %v2207_v54 = vpop.f32.mrb[31].mxu1 }
 0x519   :  { %v2258_v56 = vpop.trf.xlu0 }
 0x51a   :  { %2285 = vxpose.xlu0.b32.start [1/4] (short) (narrow) %v2258_v56, 8 }
 0x536   :  { %v2265_v57 = vpop.trf.xlu1 }
 0x537   :  { %2287 = vxpose.xlu0.b32.cont [2/4] (short) (narrow) %v2265_v57, 8 }
 0x53c   :  { %v2272_v60 = vpop.trf.xlu0 }
 0x53d   :  { %2289 = vxpose.xlu0.b32.cont [3/4] (short) (narrow) %v2272_v60, 8 }
 0x53e   :  { %v2279_v61 = vpop.trf.xlu1 }
 0x541   :  { %2291 = vxpose.xlu0.b32.end [4/4] (short) (narrow) %v2279_v61, 8 }
 0x5b5   :  { %v2292_v0 = vpop.trf.xlu0 }
 0x5b6   :  { %v2296_v2 = vunpack.i.h.bf16 %v2292_v0  ;;  %v2293_v3 = vunpack.i.l.bf16 %v2292_v0 }
 0x5b8   :  { %v1967_v4 = vpack.c.bf16 %v2296_v2, %v2293_v3 }
 0x5ba   :  { %2213 = vmatmul.mubr.msk.bf16.vlgmr.msra.gmra.mrb[32].mxu0 %vm1991_vm3, %v1967_v4 }
 0x68d   :  { %v2029_v6 = vpop.f32.mrb[32].mxu0 }
 0x68e   :  { %v2030_v7 = vadd.f32 %v2073_v5, %v2029_v6  ;;  %v2214_v8 = vpop.f32.mrb[33].mxu0 }
 0x68f   :  { %v2032_v9 = vpop.f32.mrb[34].mxu0 }
 0x690   :  { %2036 = vst [vmem:[#allocation10] sm:$0xff] %v2030_v7  ;;  %v2033_v10 = vadd.f32 %v2073_v5, %v2032_v9  ;;  %v2215_v11 = vpop.f32.mrb[35].mxu0 }
 0x692   :  { %2037 = vst [vmem:[#allocation10 + $0x8] sm:$0xff] %v2033_v10 }
 0x693   :  { %2430 = shalt.err (!%p2427_p8)
}
 0x694   :  { %s2431_s24 = scalar_lea.hbm %s2728_s5, 256 }
 0x695   :  { %p2432_p9 = scmp.ne.s32.totalorder %s2728_s5, %s2431_s24  ;;  %p2435_p10 = scmp.lt.u32.totalorder %s2431_s24, %s2728_s5 }
 0x697   :  { %p2437_p11 = pnand %p2435_p10, %p2432_p9 }
 0x699   :  { %2440 = shalt.err (!%p2437_p11)
}
 0x69a   :  { %2049 = dma.vmem_to_hbm [thread:$0]  %s2044_s20, 256, %s2728_s5, [#allocation4], %s2451_s30, %s2451_s30, %s2452_s6  }
 0x69b   :  { %2447 = dma.done.wait [#allocation4], 256  }
 0x69c   :  { %2448 = vsyncadd [#allocation4], 4294967040 }
 0x69d   :  { %2053 = vsyncpa [#allocation3], 1 }
 0x69e   :  { %2054 = vsyncpa [#allocation6], 1 }
 0x69f   :  { %2055 = vsyncpa [#allocation9], 1 }
 0x6a0   :  { %2056 = vsyncpa [#allocation4], 1 }

</bundles_post_ra>
